<compile_context>
chip_gen: v7x
topology: tpu7x:2x2x1
jax: 0.10.0
libtpu: 0.0.40
codegen_flags: <defaults>
</compile_context>

<pallas_src>
import functools
import math

import jax
import jax.numpy as jnp
from jax.experimental import pallas as pl
from jax.experimental.pallas import tpu as pltpu


def _round_up(n, k):
    return ((n + k - 1) // k) * k


def _arc_margin_kernel(xn_ref, w_ref, winv_ref, label_ref, o_ref, *,
                       cos_m, sin_m, th, mm, s, easy_margin, tile_c):
    # xn_ref:    (B, D)       bf16, rows already L2-normalized
    # w_ref:     (TILE_C, D)  bf16, raw (un-normalized) weights
    # winv_ref:  (1, TILE_C)  f32, 1 / max(||w_c||, eps) from the f32 weights
    # label_ref: (B, 1)       int32 class indices
    # o_ref:     (B, TILE_C)  f32 output tile
    raw = jax.lax.dot_general(
        xn_ref[...], w_ref[...],
        dimension_numbers=(((1,), (1,)), ((), ())),
        preferred_element_type=jnp.float32)                        # (B, TILE_C)

    cosine = raw * winv_ref[...]                                   # broadcast (1, TILE_C)

    sine = jnp.sqrt(jnp.clip(1.0 - cosine * cosine, 0.0, 1.0))
    phi = cosine * cos_m - sine * sin_m
    if easy_margin:
        phi = jnp.where(cosine > 0.0, phi, cosine)
    else:
        phi = jnp.where(cosine > th, phi, cosine - mm)

    # One-hot via iota compare, offset by this tile's first (global) class id.
    col0 = pl.program_id(0) * tile_c
    col_ids = col0 + jax.lax.broadcasted_iota(jnp.int32, cosine.shape, 1)
    is_target = col_ids == label_ref[...]                          # (B, TILE_C)

    # (one_hot*phi + (1-one_hot)*cosine) * s == (cosine + 1h*(phi-cosine)) * s
    out = (cosine + jnp.where(is_target, phi - cosine, 0.0)) * s
    o_ref[...] = out.astype(o_ref.dtype)


def arc_margin_product(x, weight, label, *, s=30.0, m=0.5, easy_margin=False,
                       tile_c=2048, stream_dtype=jnp.bfloat16):
    """ArcFace forward.  x: (B, D), weight: (C, D), label: (B,) int.
    Returns (B, C) float32 logits (already scaled by s)."""
    B, D = x.shape
    C, D2 = weight.shape
    assert D == D2, "in_features mismatch"

    eps = 1e-12

    # Hoisted x normalization (f32 once, not once per C tile), then cast to
    # the bf16 streaming dtype for the MXU.
    xf = x.astype(jnp.float32)
    xn = xf / jnp.maximum(jnp.linalg.norm(xf, axis=-1, keepdims=True), eps)
    xn = xn.astype(stream_dtype)

    # Per-class reciprocal norms of W in full f32 precision (hoisted out of
    # the kernel).  W itself is streamed raw in bf16; the cosine is the raw
    # bf16 dot rescaled by these f32 reciprocal norms.
    wf = weight.astype(jnp.float32)
    w_inv = 1.0 / jnp.maximum(jnp.linalg.norm(wf, axis=-1), eps)    # (C,) f32
    w = weight.astype(stream_dtype)
    label2d = label.reshape(B, 1).astype(jnp.int32)

    # Tile the class dimension: multiple of 128 (lane-dense output stores).
    tile_c = max(128, min(_round_up(tile_c, 128), _round_up(C, 128)))
    c_pad = _round_up(C, tile_c)
    if c_pad != C:
        w = jnp.pad(w, ((0, c_pad - C), (0, 0)))
        w_inv = jnp.pad(w_inv, (0, c_pad - C))
    w_inv = w_inv.reshape(1, c_pad).astype(jnp.float32)
    grid_c = c_pad // tile_c

    cos_m = math.cos(m)
    sin_m = math.sin(m)
    th = math.cos(math.pi - m)
    mm = math.sin(math.pi - m) * m

    kernel = functools.partial(
        _arc_margin_kernel, cos_m=cos_m, sin_m=sin_m, th=th, mm=mm, s=s,
        easy_margin=easy_margin, tile_c=tile_c)

    itemsize = jnp.dtype(stream_dtype).itemsize
    w_tile_bytes = tile_c * D * itemsize
    out_tile_bytes = B * tile_c * 4
    winv_tile_bytes = tile_c * 4
    # Double-buffered W / winv / output tiles, resident xn & labels, + slack.
    vmem_bytes = (2 * (w_tile_bytes + out_tile_bytes + winv_tile_bytes)
                  + B * D * itemsize + (4 << 20))
    vmem_bytes = int(min(max(vmem_bytes, 16 << 20), 48 << 20))  # v7x-safe cap

    cost = pl.CostEstimate(
        flops=2 * B * c_pad * D,
        transcendentals=B * c_pad,
        bytes_accessed=(c_pad * D * itemsize + B * D * itemsize
                        + c_pad * 4 + B * 4 + B * c_pad * 4))

    out = pl.pallas_call(
        kernel,
        out_shape=jax.ShapeDtypeStruct((B, c_pad), jnp.float32),
        grid_spec=pltpu.PrefetchScalarGridSpec(
            num_scalar_prefetch=0,
            grid=(grid_c,),
            in_specs=[
                pl.BlockSpec((B, D), lambda j: (0, 0)),        # xn (resident)
                pl.BlockSpec((tile_c, D), lambda j: (j, 0)),   # W tile (streamed)
                pl.BlockSpec((1, tile_c), lambda j: (0, j)),   # 1/||W|| tile
                pl.BlockSpec((B, 1), lambda j: (0, 0)),        # labels (resident)
            ],
            out_specs=pl.BlockSpec((B, tile_c), lambda j: (0, j)),
        ),
        compiler_params=pltpu.CompilerParams(
            dimension_semantics=("parallel",),                 # megacore on v7x
            vmem_limit_bytes=vmem_bytes),
        cost_estimate=cost,
    )(xn, w, w_inv, label2d)

    return out[:, :C] if c_pad != C else out


def _reference(x, weight, label, *, s=30.0, m=0.5, easy_margin=False,
               stream_dtype=None):
    """Plain-JAX reference mirroring the PyTorch forward.  If stream_dtype is
    given, the matmul operands are rounded to it (mirroring the kernel's bf16
    streaming) but all math — including the W norms — is done in f32."""
    eps = 1e-12
    xf = x.astype(jnp.float32)
    xn = xf / jnp.maximum(jnp.linalg.norm(xf, axis=-1, keepdims=True), eps)
    wf = weight.astype(jnp.float32)
    inv_w = 1.0 / jnp.maximum(jnp.linalg.norm(wf, axis=-1), eps)
    wd = wf
    if stream_dtype is not None:
        xn = xn.astype(stream_dtype).astype(jnp.float32)
        wd = wf.astype(stream_dtype).astype(jnp.float32)
    cosine = (xn @ wd.T) * inv_w[None, :]
    sine = jnp.sqrt(jnp.clip(1.0 - cosine ** 2, 0.0, 1.0))
    phi = cosine * math.cos(m) - sine * math.sin(m)
    if easy_margin:
        phi = jnp.where(cosine > 0.0, phi, cosine)
    else:
        phi = jnp.where(cosine > math.cos(math.pi - m), phi,
                        cosine - math.sin(math.pi - m) * m)
    one_hot = jax.nn.one_hot(label, weight.shape[0], dtype=cosine.dtype)
    return (one_hot * phi + (1.0 - one_hot) * cosine) * s


if __name__ == "__main__":
    in_features = 128
    out_features = 512
    batch = 8

    key = jax.random.PRNGKey(0)
    kx, kw, kl = jax.random.split(key, 3)

    x = jax.random.normal(kx, (batch, in_features), dtype=jnp.float32)

    # Deterministic xavier_uniform_ init: U(-a, a), a = sqrt(6/(fan_in+fan_out))
    bound = math.sqrt(6.0 / (in_features + out_features))
    weight = jax.random.uniform(kw, (out_features, in_features),
                                dtype=jnp.float32, minval=-bound, maxval=bound)

    label = jax.random.randint(kl, (batch,), 0, out_features, dtype=jnp.int32)

    # tile_c=128 -> 4 class tiles, exercising the streamed/offset one-hot path.
    out = arc_margin_product(x, weight, label, s=30.0, m=0.5, easy_margin=False,
                             tile_c=128)
    out = jax.block_until_ready(out)
    assert out.shape == (batch, out_features)

    # Tight check vs a reference that mirrors the kernel's bf16 streaming
    # (bf16 matmul operands, f32 weight norms).
    ref_bf16 = _reference(x, weight, label, s=30.0, m=0.5, easy_margin=False,
                          stream_dtype=jnp.bfloat16)
    assert jnp.allclose(out, ref_bf16, atol=2e-3, rtol=2e-3), \
        "mismatch vs bf16-stream reference"

    # Loose sanity check vs the pure-f32 PyTorch-faithful reference
    # (differences are bf16-rounding of the streamed operands, scaled by s).
    ref_f32 = _reference(x, weight, label, s=30.0, m=0.5, easy_margin=False)
    assert jnp.allclose(out, ref_f32, atol=0.3), "mismatch vs f32 reference"

    print("KERNEL_OK")
</pallas_src>

<mosaic_0001>
module attributes {stable_mosaic.version = 11 : i64} {
  func.func @_arc_margin_kernel(%arg0: i32, %arg1: memref<8x128xbf16, #tpu.memory_space<vmem>>, %arg2: memref<128x128xbf16, #tpu.memory_space<vmem>>, %arg3: memref<1x128xf32, #tpu.memory_space<vmem>>, %arg4: memref<8x1xi32, #tpu.memory_space<vmem>>, %arg5: memref<8x128xf32, #tpu.memory_space<vmem>>) attributes {dimension_semantics = [#tpu.dimension_semantics<parallel>], iteration_bounds = array<i64: 4>, scalar_prefetch = 0 : i64, scratch_operands = 0 : i64, tpu.core_type = #tpu.core_type<tc>, window_params = [{pipeline_mode = #tpu.pipeline_mode<synchronous>, transform_indices = @transform_0, window_bounds = array<i64: 8, 128>}, {transform_indices = @transform_1, window_bounds = array<i64: 128, 128>}, {transform_indices = @transform_2, window_bounds = array<i64: 1, 128>}, {pipeline_mode = #tpu.pipeline_mode<synchronous>, transform_indices = @transform_3, window_bounds = array<i64: 8, 1>}, {transform_indices = @transform_4, window_bounds = array<i64: 8, 128>}]} {
    %c0 = arith.constant 0 : index
    %c0_0 = arith.constant 0 : index
    %0 = vector.load %arg1[%c0, %c0_0] : memref<8x128xbf16, #tpu.memory_space<vmem>>, vector<8x128xbf16>
    %c0_1 = arith.constant 0 : index
    %c0_2 = arith.constant 0 : index
    %1 = vector.load %arg2[%c0_1, %c0_2] : memref<128x128xbf16, #tpu.memory_space<vmem>>, vector<128x128xbf16>
    %cst = arith.constant dense<0.000000e+00> : vector<8x128xf32>
    %2 = tpu.matmul %0, %1, %cst {dimension_numbers = #tpu.dot_dimension_numbers<[1], [1], [0], [0], [0, 0, 1, 0], [], []>} : vector<8x128xbf16>, vector<128x128xbf16>, vector<8x128xf32> -> vector<8x128xf32>
    %c0_3 = arith.constant 0 : index
    %c0_4 = arith.constant 0 : index
    %3 = vector.load %arg3[%c0_3, %c0_4] : memref<1x128xf32, #tpu.memory_space<vmem>>, vector<1x128xf32>
    %4 = vector.broadcast %3 : vector<1x128xf32> to vector<8x128xf32>
    %5 = arith.mulf %2, %4 : vector<8x128xf32>
    %6 = arith.mulf %5, %5 : vector<8x128xf32>
    %cst_5 = arith.constant 1.000000e+00 : f32
    %7 = vector.broadcast %cst_5 : f32 to vector<8x128xf32>
    %8 = arith.subf %7, %6 : vector<8x128xf32>
    %cst_6 = arith.constant 0.000000e+00 : f32
    %cst_7 = arith.constant 1.000000e+00 : f32
    %9 = vector.broadcast %cst_6 : f32 to vector<8x128xf32>
    %10 = arith.maximumf %9, %8 : vector<8x128xf32>
    %11 = vector.broadcast %cst_7 : f32 to vector<8x128xf32>
    %12 = arith.minimumf %11, %10 : vector<8x128xf32>
    %13 = math.sqrt %12 : vector<8x128xf32>
    %cst_8 = arith.constant 0.87758255 : f32
    %14 = vector.broadcast %cst_8 : f32 to vector<8x128xf32>
    %15 = arith.mulf %5, %14 : vector<8x128xf32>
    %cst_9 = arith.constant 0.47942555 : f32
    %16 = vector.broadcast %cst_9 : f32 to vector<8x128xf32>
    %17 = arith.mulf %13, %16 : vector<8x128xf32>
    %18 = arith.subf %15, %17 : vector<8x128xf32>
    %cst_10 = arith.constant -0.87758255 : f32
    %19 = vector.broadcast %cst_10 : f32 to vector<8x128xf32>
    %20 = arith.cmpf ogt, %5, %19 : vector<8x128xf32>
    %cst_11 = arith.constant 0.239712775 : f32
    %21 = vector.broadcast %cst_11 : f32 to vector<8x128xf32>
    %22 = arith.subf %5, %21 : vector<8x128xf32>
    %23 = arith.select %20, %18, %22 : vector<8x128xi1>, vector<8x128xf32>
    %c128_i32 = arith.constant 128 : i32
    %24 = arith.muli %arg0, %c128_i32 : i32
    %25 = tpu.iota {dimensions = array<i32: 1>} : vector<8x128xi32>
    %26 = vector.broadcast %24 : i32 to vector<8x128xi32>
    %27 = arith.addi %26, %25 : vector<8x128xi32>
    %c0_12 = arith.constant 0 : index
    %c0_13 = arith.constant 0 : index
    %28 = vector.load %arg4[%c0_12, %c0_13] : memref<8x1xi32, #tpu.memory_space<vmem>>, vector<8x1xi32>
    %29 = vector.broadcast %28 : vector<8x1xi32> to vector<8x128xi32>
    %30 = arith.cmpi eq, %27, %29 : vector<8x128xi32>
    %31 = arith.subf %23, %5 : vector<8x128xf32>
    %cst_14 = arith.constant 0.000000e+00 : f32
    %32 = vector.broadcast %cst_14 : f32 to vector<8x128xf32>
    %33 = arith.select %30, %31, %32 : vector<8x128xi1>, vector<8x128xf32>
    %34 = arith.addf %5, %33 : vector<8x128xf32>
    %cst_15 = arith.constant 3.000000e+01 : f32
    %35 = vector.broadcast %cst_15 : f32 to vector<8x128xf32>
    %36 = arith.mulf %34, %35 : vector<8x128xf32>
    %c0_16 = arith.constant 0 : index
    %c0_17 = arith.constant 0 : index
    %37 = vector.load %arg5[%c0_16, %c0_17] : memref<8x128xf32, #tpu.memory_space<vmem>>, vector<8x128xf32>
    tpu.vector_store %arg5[%c0_16, %c0_17], %36 {strides = array<i32>} : memref<8x128xf32, #tpu.memory_space<vmem>>, vector<8x128xf32>,
    return
  }
  func.func @transform_0(%arg0: i32) -> (i32, i32) {
    %c0_i32 = arith.constant 0 : i32
    %c0_i32_0 = arith.constant 0 : i32
    %c0_i32_1 = arith.constant 0 : i32
    return %c0_i32, %c0_i32_0 : i32, i32
  }
  func.func @transform_1(%arg0: i32) -> (i32, i32) {
    %c0_i32 = arith.constant 0 : i32
    %c0_i32_0 = arith.constant 0 : i32
    return %arg0, %c0_i32 : i32, i32
  }
  func.func @transform_2(%arg0: i32) -> (i32, i32) {
    %c0_i32 = arith.constant 0 : i32
    %c0_i32_0 = arith.constant 0 : i32
    return %c0_i32, %arg0 : i32, i32
  }
  func.func @transform_3(%arg0: i32) -> (i32, i32) {
    %c0_i32 = arith.constant 0 : i32
    %c0_i32_0 = arith.constant 0 : i32
    %c0_i32_1 = arith.constant 0 : i32
    return %c0_i32, %c0_i32_0 : i32, i32
  }
  func.func @transform_4(%arg0: i32) -> (i32, i32) {
    %c0_i32 = arith.constant 0 : i32
    %c0_i32_0 = arith.constant 0 : i32
    return %c0_i32, %arg0 : i32, i32
  }
}

</mosaic_0001>

<bundles_post_ra>
// kernel: tpu_custom_call.1
= control target key start
LH: loop header
LB: loop body
LE: loop exit
PB: predicated region body
PF: predicated region fallthrough
CT: control target
= control target key end

     0   :  { %9 = vsyncpa [#allocation3], 0  ;;  %s896_s0 = inlined_call_operand.vmem [shape: bf16[8,128], index: 0, kind: input, shape index: {}]   ;;  %s897_s1 = inlined_call_operand.hbm [shape: bf16[512,128], index: 1, kind: input, shape index: {}]   ;;  %s898_s2 = inlined_call_operand.vmem [shape: f32[1,512], index: 2, kind: input, shape index: {}]   ;;  %s899_s3 = inlined_call_operand.vmem [shape: s32[8,1], index: 3, kind: input, shape index: {}]   ;;  %s900_s4 = inlined_call_operand.hbm [shape: f32[8,512], index: 4, kind: output, shape index: {}]  }
   0x1   :  { %11 = vsyncpa [#allocation3 + $0x1], 0 }
   0x2   :  { %12 = vsyncpa [#allocation4], 0 }
   0x3   :  { %14 = vsyncpa [#allocation4 + $0x1], 0  ;;  %s716_s15 = smov 0   ;;  %s718_s16 = smov 0  }
   0x4   :  { %s720_s17 = smov 0   ;;  %s722_s18 = smov 0  }
   0x5 LB: > { %s737_s19 = sadd.s32 4294967295, %s682_s18   ;;  %s470_s20 = sadd.s32 4294967294, %s682_s18   ;;  %s682_s18 = sphi %s722_s18, %s912_s18   ;;  %s678_s17 = sphi %s720_s17, %s911_s17   ;;  %s674_s16 = sphi %s718_s16, %s910_s16   ;;  %s670_s15 = sphi %s716_s15, %s909_s15  }
   0x6   : > { %s741_s21 = sadd.s32 1, %s682_s18   ;;  %s48_s22 = sadd.s32 1, %s678_s17 }
   0x7   : > { %s45_s23 = ssub.s32 %s682_s18, %s741_s21  ;;  %p55_p0 = scmp.ne.s32.totalorder %s678_s17, %s674_s16 }
   0x8   : > { %p46_p1 = scmp.eq.s32.totalorder %s45_s23, 0  ;;  %p56_p2 = scmp.eq.s32.totalorder %s682_s18, 0 }
   0x9   : > { %p61_p3 = scmp.ne.s32.totalorder %s674_s16, %s670_s15  ;;  %p62_p4 = scmp.eq.s32.totalorder %s737_s19, 0 }
   0xa   : > { %s753_s24 = scalar_select %p46_p1, %s678_s17, %s48_s22  }
   0xb   : > { %p755_p5 = por %p56_p2, %p55_p0  ;;  %p759_p6 = por %p62_p4, %p61_p3 }
   0xc   : > { %p132_p7 = scmp.eq.s32.totalorder %s737_s19, 3  ;;  %p138_p8 = scmp.eq.s32.totalorder %s470_s20, 3 }
   0xd   : > { %p536_p9 = scmp.lt.s32.totalorder %s682_s18, 4  ;;  %s164_s29 = sand.u32 1, %s678_s17  }
   0xe   : > { %p765_p10 = por %p132_p7, %p55_p0  ;;  %p769_p11 = por %p138_p8, %p61_p3 }
   0xf   : > { %s494_s30 = sshll.u32 %s682_s18, 10  ;;  %s473_s5 = sshll.u32 %s164_s29, 6 }
  0x10   : > { %s904_s27 = scalar_select %p765_p10, 1, 0 }
  0x11   : > { %s905_s28 = scalar_select %p769_p11, 1, 0 }
  0x12   : > { %s778_s8 = scalar_lea.hbm %s897_s1, %s494_s30  ;;  %s168_s9 = scalar_lea.vmem [#allocation2], %s473_s5 }
  0x13   : > { %s175_s10 = sshll.u32 %s168_s9, 4  ;;  %p782_p12 = pnand %p536_p9, %p755_p5  ;;  %s786_s10 = int_to_ptr.vmem [resolvable:$true] %s175_s10 }
  0x14   : > { %s788_s12 = scalar_lea.sflag [#allocation3], %s164_s29  ;;  %s586_s13 = scalar_lea.hbm %s778_s8, 1024 }
  0x15   : > { %p587_p13 = scmp.ne.s32.totalorder %s778_s8, %s586_s13  ;;  %p588_p0 = pneg %p782_p12 }
  0x16   : > { %s591_s22 = scalar_lea.hbm %s897_s1, 4096  ;;  %p592_p3 = scmp.lt.u32.totalorder %s778_s8, %s897_s1 }
  0x17   : > { %p589_p1 = pnand %p588_p0, %p587_p13  ;;  %p593_p4 = scmp.lt.u32.totalorder %s591_s22, %s586_s13 }
  0x18   : > { %p595_p7 = scmp.lt.u32.totalorder %s586_s13, %s778_s8 }
  0x19   : > { %p590_p2 = pneg %p589_p1  ;;  %p594_p5 = por %p593_p4, %p592_p3 }
  0x1b   : > { %p596_p8 = por %p595_p7, %p594_p5 }
  0x1d   : > { %p597_p9 = pnand %p596_p8, %p590_p2 }
  0x1f   : > { %600 = shalt.err (!%p597_p9)
}
  0x20   : > { %s601_s29 = scalar_lea.vmem %s786_s10, 1024  ;;  %s684_s30 = smov [#allocation2]  }
  0x21   : > { %p602_p13 = scmp.ne.s32.totalorder %s786_s10, %s601_s29  ;;  %s606_s5 = sshll.u32 %s684_s30, 4  ;;  %s607_s5 = int_to_ptr.vmem [resolvable:$false] %s606_s5 }
  0x22   : > { %s608_s6 = scalar_lea.vmem %s607_s5, 2048  ;;  %p609_p10 = scmp.lt.s32.totalorder %s786_s10, %s607_s5 }
  0x23   : > { %p604_p1 = pnand %p602_p13, %p588_p0  ;;  %p610_p3 = scmp.lt.s32.totalorder %s608_s6, %s601_s29 }
  0x25   : > { %p605_p11 = pneg %p604_p1  ;;  %p611_p4 = por %p610_p3, %p609_p10 }
  0x27   : > { %p612_p5 = pnand %p611_p4, %p605_p11 }
  0x29   : > { %615 = shalt.err (!%p612_p5)
}
  0x2a   : > { %s685_s7 = smov 64   ;;  %s686_s9 = smov 4  }
  0x2b   : > { %531 = dma.hbm_to_vmem [thread:$0]  (!%p782_p12), %s778_s8, 1024, %s786_s10, %s788_s12, %s685_s7, %s685_s7, %s686_s9  }
  0x2c   : > { %p476_p0 = scmp.ge.s32.totalorder %s682_s18, 1  ;;  %p189_p2 = scmp.lt.s32.totalorder %s682_s18, 5 }
  0x2e   : > { %p190_p7 = pnand %p476_p0, %p189_p2 }
  0x2f   : > { %s819_s13 = sand.u32 (!%p190_p7), 1, %s674_s16  }
  0x30   : > { %193 = sbr.rel (%p190_p7) target bundleno = 384 (0x180), region = 36  ;;  %s477_s14 = sshll.u32 (!%p190_p7), %s819_s13, 6 }
  0x31   : > { %s196_s20 = scalar_lea.sflag (!%p190_p7), [#allocation3], %s819_s13  ;;  %s823_s22 = scalar_lea.vmem (!%p190_p7), [#allocation2], %s477_s14 }
  0x37   : > { %661 = dma.done.wait (%p759_p6), %s196_s20, 1024  }
  0x38   : > { %663 = vsyncadd (%p759_p6), %s196_s20, 4294966272  ;;  %v687_v0 = vmov 0.0   ;;  %vm688_vm0 = vmmov 0   ;;  %v689_v1 = vmov 0   ;;  %v576_v2 = vld [vmem:[%s823_s22] sm:$0xff]   ;;  %v577_v3 = vld [vmem:[%s823_s22 + $0x8] sm:$0xff]   ;;  %v363_v22 = vlaneseq }
  0x39   : > { %504 = vmatprep.subr.bf16.mxu0 %v687_v0  ;;  %520 = vmatprep.mubr.msk.bf16.mxu0 %vm688_vm0, %v687_v0  ;;  %v367_v4 = vld [vmem:[%s899_s3] sm:$0xff]  ;;  %v578_v5 = vld [vmem:[%s823_s22 + $0x10] sm:$0xff]   ;;  %v579_v6 = vld [vmem:[%s823_s22 + $0x18] sm:$0xff]   ;;  %p228_p6 = scmp.lt.s32.totalorder %s737_s19, 3  ;;  %s489_s30 = sshll.u32 %s737_s19, 7 }
  0x3a   : > { %575 = vset.pattern.permute.xlu0 %v689_v1  ;;  %505 = vmatpush3.bf16.xpose.msra.mxu0 %v576_v2  ;;  %v580_v7 = vld [vmem:[%s823_s22 + $0x20] sm:$0xff]   ;;  %v581_v8 = vld [vmem:[%s823_s22 + $0x28] sm:$0xff]   ;;  %v582_v9 = vld [vmem:[%s823_s22 + $0x30] sm:$0xff]   ;;  %v364_v24 = vand.u32 127, %v363_v22  ;;  %v365_v26 = vstv %s489_s30  ;;  %s478_s5 = sshll.u32 %s819_s13, 3  ;;  %s853_s14 = scalar_lea.hbm %s900_s4, %s489_s30 }
  0x3b   : > { %506 = vmatprep.subr.bf16.mxu0 %v687_v0  ;;  %369 = vperm.xlu0 %575, %v367_v4   ;;  %v583_v10 = vld [vmem:[%s823_s22 + $0x38] sm:$0xff]   ;;  %v232_v11 = vld [vmem:[%s896_s0] sm:$0xf]  ;;  %s229_s12 = scalar_select %p228_p6, %s737_s19, 3 }
  0x3c   : > { %v366_v30 = vadd.s32 %v365_v26, %v364_v24  ;;  %s226_s19 = scalar_lea.vmem [#allocation5], %s478_s5  ;;  %s378_s20 = scalar_lea.sflag [#allocation4], %s819_s13 }
  0x3d   : > { %s230_s29 = scalar_lea.vmem %s898_s2, %s229_s12  ;;  %s391_s6 = sshll.u32 %s226_s19, 4  ;;  %s855_s6 = int_to_ptr.vmem [resolvable:$true] %s391_s6 }
  0x3e   : > { %v487_v12 = vld [vmem:[%s230_s29] ss:$0 sm:$0xff]  ;;  %s616_s22 = scalar_lea.vmem %s855_s6, 128  ;;  %p907_p11 = scmp.ne.s32.totalorder %s904_s27, 0 }
  0x3f   : > { %p617_p10 = scmp.ne.s32.totalorder %s855_s6, %s616_s22  ;;  %s690_s8 = smov [#allocation5]  }
  0x40   : > { %s620_s10 = sshll.u32 %s690_s8, 4  ;;  %s621_s10 = int_to_ptr.vmem [resolvable:$false] %s620_s10 }
  0x41   : > { %p618_p12 = pnand %p617_p10, %p907_p11  ;;  %s622_s26 = scalar_lea.vmem %s621_s10, 256 }
  0x42   : > { %507 = vmatpush3.bf16.xpose.msra.mxu0 %v577_v3  ;;  %p623_p9 = scmp.lt.s32.totalorder %s855_s6, %s621_s10  ;;  %p624_p13 = scmp.lt.s32.totalorder %s622_s26, %s616_s22 }
  0x43   : > { %508 = vmatprep.subr.bf16.mxu0 %v687_v0  ;;  %p619_p8 = pneg %p618_p12 }
  0x44   : > { %p625_p1 = por %p624_p13, %p623_p9 }
  0x46   : > { %p626_p3 = pnand %p625_p1, %p619_p8 }
  0x4a   : > { %509 = vmatpush3.bf16.xpose.msra.mxu0 %v578_v5 }
  0x4b   : > { %510 = vmatprep.subr.bf16.mxu0 %v687_v0 }
  0x52   : > { %511 = vmatpush3.bf16.xpose.msra.mxu0 %v579_v6 }
  0x53   : > { %512 = vmatprep.subr.bf16.mxu0 %v687_v0 }
  0x5a   : > { %513 = vmatpush3.bf16.xpose.msra.mxu0 %v580_v7 }
  0x5b   : > { %514 = vmatprep.subr.bf16.mxu0 %v687_v0 }
  0x62   : > { %515 = vmatpush3.bf16.xpose.msra.mxu0 %v581_v8 }
  0x63   : > { %516 = vmatprep.subr.bf16.mxu0 %v687_v0 }
  0x6a   : > { %517 = vmatpush3.bf16.xpose.msra.mxu0 %v582_v9 }
  0x6b   : > { %518 = vmatprep.subr.bf16.mxu0 %v687_v0 }
  0x72   : > { %519 = vmatpush3.bf16.xpose.msra.mxu0 %v583_v10 }
  0x79   : > { %521 = vmatmul.mubr.bf16.vlgmr.msra.gmra.mrb[0].mxu0 %v232_v11 }
  0xba   : > { %v370_v33 = vpop.permute.xlu0 %369 }
  0xbb   : > { %vm371_vm4 = vcmp.eq.s32.totalorder %v366_v30, %v370_v33 }
 0x14c   : > { %v331_v13 = vpop.f32.mrb[0].mxu0 }
 0x14d   : > { %v344_v14 = vmul.f32 %v487_v12, %v331_v13  ;;  %v522_v15 = vpop.f32.mrb[1].mxu0 }
 0x14e   : > { %v334_v16 = vpop.f32.mrb[2].mxu0 }
 0x14f   : > { %v345_v17 = vmul.f32 %v344_v14, %v344_v14  ;;  %v523_v18 = vpop.f32.mrb[3].mxu0  ;;  %v356_v31 = vmul.f32 0.87758255, %v344_v14  ;;  %v488_v35 = vadd.f32 -0.23971277, %v344_v14 }
 0x150   : > { %vm359_vm3 = vcmp.gt.f32.partialorder %v344_v14, -0.87758255 }
 0x151   : > { %v346_v19 = vsub.f32 1.0, %v345_v17 }
 0x153   : > { %v347_v20 = vmax.f32 %v346_v19, 0.0 }
 0x155   : > { %v348_v21 = vmin.f32 %v347_v20, 1.0 }
 0x157   : > { %584 = vrsqrt.f32 %v348_v21  ;;  %vm351_vm1 = vcmp.eq.f32.partialorder %v348_v21, inf  ;;  %v354_v27 = vand.u32 2147483648, %v348_v21  ;;  %vm353_vm2 = vcmp.eq.f32.partialorder %v348_v21, 0.0 }
 0x161   : > { %v585_v23 = vpop.eup %584 }
 0x162   : > { %v350_v25 = vmul.f32 %v585_v23, %v348_v21 }
 0x164   : > { %v352_v28 = vsel %vm351_vm1, %v348_v21, %v350_v25 }
 0x165   : > { %v355_v29 = vsel %vm353_vm2, %v354_v27, %v352_v28 }
 0x166   : > { %v357_v32 = vmul.f32 0.47942555, %v355_v29 }
 0x168   : > { %v358_v34 = vsub.f32 %v356_v31, %v357_v32 }
 0x16a   : > { %v361_v36 = vsel %vm359_vm3, %v358_v34, %v488_v35 }
 0x16b   : > { %v372_v37 = vsub.f32 %v361_v36, %v344_v14 }
 0x16d   : > { %v373_v38 = vsel %vm371_vm4, %v372_v37, 0.0 }
 0x16e   : > { %v374_v39 = vadd.f32 %v373_v38, %v344_v14 }
 0x170   : > { %v375_v40 = vmul.f32 30.0, %v374_v39 }
 0x172   : > { %376 = vst [vmem:[%s226_s19] sm:$0xff] %v375_v40 }
 0x173   : > { %629 = shalt.err (!%p626_p3)
}
 0x174   : > { %s630_s13 = scalar_lea.hbm %s853_s14, 128  ;;  %s634_s23 = scalar_lea.hbm %s900_s4, 512 }
 0x175   : > { %p631_p4 = scmp.ne.s32.totalorder %s853_s14, %s630_s13  ;;  %p635_p2 = scmp.lt.u32.totalorder %s853_s14, %s900_s4 }
 0x176   : > { %p636_p7 = scmp.lt.u32.totalorder %s634_s23, %s630_s13  ;;  %p638_p10 = scmp.lt.u32.totalorder %s630_s13, %s853_s14 }
 0x177   : > { %p632_p5 = pnand %p631_p4, %p907_p11 }
 0x178   : > { %p637_p6 = por %p636_p7, %p635_p2 }
 0x179   : > { %p633_p0 = pneg %p632_p5 }
 0x17a   : > { %p639_p12 = por %p638_p10, %p637_p6 }
 0x17c   : > { %p640_p8 = pnand %p639_p12, %p633_p0 }
 0x17e   : > { %643 = shalt.err (!%p640_p8)
}
 0x17f   : > { %526 = dma.vmem_to_hbm [thread:$0]  (%p907_p11), %s855_s6, 128, %s853_s14, %s378_s20  }
 0x180 PF: > { %p537_p9 = scmp.ge.s32.totalorder %s682_s18, 2  ;;  %s403_s30 = sand.u32 1, %s670_s15  }
 0x181   : > { %p908_p13 = scmp.ne.s32.totalorder %s905_s28, 0  ;;  %s404_s5 = scalar_lea.sflag [#allocation4], %s403_s30 }
 0x183   : > { %p533_p1 = pnand %p537_p9, %p908_p13 }
 0x185   : > { %665 = dma.done.wait (!%p533_p1), %s404_s5, 128  }
 0x186   : > { %667 = vsyncadd (!%p533_p1), %s404_s5, 4294967168  ;;  %p17_p3 = scmp.ge.s32.totalorder %s741_s21, 6   ;;  %s909_s15 = smov %s674_s16 }
 0x187   : > { %s910_s16 = smov %s678_s17  ;;  %s911_s17 = smov %s753_s24 }
 0x188   : > { %s912_s18 = smov %s741_s21  ;;  %19 = sbr.rel (!%p17_p3) target bundleno = 5 (0x5), region = 84 }
 0x18f   :  { %409 = vsyncpa [#allocation3], 1 }
 0x190   :  { %411 = vsyncpa [#allocation3 + $0x1], 1 }
 0x191   :  { %412 = vsyncpa [#allocation4], 1 }
 0x192   :  { %414 = vsyncpa [#allocation4 + $0x1], 1 }

</bundles_post_ra>
